<compile_context>
chip_gen: v7x
topology: tpu7x:2x2x1
jax: 0.10.0
libtpu: 0.0.40
codegen_flags: <defaults>
</compile_context>

<pallas_src>
import jax
import jax.numpy as jnp
from jax.experimental import pallas as pl
from jax.experimental.pallas import tpu as pltpu


# ---------------------------------------------------------------- kernels ----

def _prelu_vecw_kernel(x_ref, w_ref, o_ref):
    # x_ref/o_ref: (rows_tile, cols_tile) tile. w_ref: (rows_tile, 1) or
    # (1, cols_tile) float32 weights; cast once to x's dtype and broadcast.
    x = x_ref[...]
    w = w_ref[...].astype(x.dtype)
    o_ref[...] = jnp.where(x > 0, x, w * x).astype(o_ref.dtype)


def _prelu_scalarw_kernel(x_ref, w_ref, o_ref):
    # w_ref: (1, 1) float32 scalar living in SMEM.
    x = x_ref[...]
    w = w_ref[0, 0].astype(x.dtype)
    o_ref[...] = jnp.where(x > 0, x, w * x).astype(o_ref.dtype)


# ------------------------------------------------------------ tile sizing ----

_BLOCK_BYTES = 2 * 1024 * 1024          # per-block byte budget for the x tile
_SUBLANE_UNIT = {4: 8, 2: 16, 1: 32}    # packed-sublane unit per itemsize


def _choose_tiles(rows, cols, itemsize):
    """Byte-budget tile selection for a (rows, cols) lane-dense stream.

    Columns (lane axis) are widened first -- lane-dense stores are the biggest
    measured lever -- then rows fill the remaining budget. Each tile dim is
    either a multiple of its hardware unit or the full array extent (always a
    legal block shape); ragged edges are handled by pl.cdiv grids + masking.
    """
    sub = _SUBLANE_UNIT.get(itemsize, 8)
    lane = 128
    max_elems = max(_BLOCK_BYTES // itemsize, sub * lane)

    cols_cap = max(lane, (max_elems // sub) // lane * lane)
    cols_tile = cols if cols <= cols_cap else cols_cap

    cols_pad = -(-cols_tile // lane) * lane          # VMEM footprint of the lane dim
    rows_cap = max(sub, (max_elems // cols_pad) // sub * sub)
    rows_tile = rows if rows <= rows_cap else rows_cap
    return rows_tile, cols_tile


# ---------------------------------------------------------------- wrapper ----

def my_prelu(x, weight):
    """PReLU forward. x: (N, C, *spatial). weight: (1,) or (C,)."""
    orig_shape = x.shape
    N, C = orig_shape[0], orig_shape[1]
    HW = 1
    for d in orig_shape[2:]:
        HW *= d

    itemsize = jnp.dtype(x.dtype).itemsize
    w32 = weight.astype(jnp.float32)
    compiler_params = pltpu.CompilerParams(
        dimension_semantics=("parallel", "parallel"))

    # ---- scalar-weight path: weight as a (1,1) SMEM scalar --------------
    if weight.shape[0] == 1:
        R, L = N, C * HW                     # widest lane-dense view
        x2 = x.reshape(R, L)
        rows_tile, cols_tile = _choose_tiles(R, L, itemsize)
        grid = (pl.cdiv(R, rows_tile), pl.cdiv(L, cols_tile))
        out2 = pl.pallas_call(
            _prelu_scalarw_kernel,
            grid=grid,
            in_specs=[
                pl.BlockSpec((rows_tile, cols_tile), lambda i, j: (i, j)),
                pl.BlockSpec(memory_space=pltpu.MemorySpace.SMEM),
            ],
            out_specs=pl.BlockSpec((rows_tile, cols_tile), lambda i, j: (i, j)),
            out_shape=jax.ShapeDtypeStruct((R, L), x.dtype),
            compiler_params=compiler_params,
        )(x2, w32.reshape(1, 1))
        return out2.reshape(orig_shape)

    # ---- per-channel path -----------------------------------------------
    assert weight.shape[0] == C, "per-channel weight must have C entries"

    per_row = (HW >= 128) and (HW % 128 == 0)
    if per_row:
        # Layout A: rows index (n, c); lanes = spatial (already 128-multiple).
        R, L = N * C, HW
    else:
        # Layout B: fold channels into lanes so the output stays lane-dense
        # even for small / non-128-multiple spatial extents.
        R, L = N, C * HW
    x2 = x.reshape(R, L)
    rows_tile, cols_tile = _choose_tiles(R, L, itemsize)
    grid = (pl.cdiv(R, rows_tile), pl.cdiv(L, cols_tile))

    if per_row:
        w_arr = jnp.tile(w32, N).reshape(R, 1)                 # row r -> weight[r % C]
        w_spec = pl.BlockSpec((rows_tile, 1), lambda i, j: (i, 0))
    else:
        w_arr = jnp.repeat(w32, HW).reshape(1, L)              # lane l -> weight[l // HW]
        w_spec = pl.BlockSpec((1, cols_tile), lambda i, j: (0, j))

    out2 = pl.pallas_call(
        _prelu_vecw_kernel,
        grid=grid,
        in_specs=[
            pl.BlockSpec((rows_tile, cols_tile), lambda i, j: (i, j)),
            w_spec,
        ],
        out_specs=pl.BlockSpec((rows_tile, cols_tile), lambda i, j: (i, j)),
        out_shape=jax.ShapeDtypeStruct((R, L), x.dtype),
        compiler_params=compiler_params,
    )(x2, w_arr)
    return out2.reshape(orig_shape)

# TODO(synk): only the forward pass is implemented; MyPReLUFunction.backward
# (grad_input / grad_weight) is not translated.


# ------------------------------------------------------------------- main ----

if __name__ == "__main__":
    key = jax.random.PRNGKey(0)
    k0, k1 = jax.random.split(key)

    N, C, H, W = 2, 4, 16, 16
    x = jax.random.normal(k0, (N, C, H, W), dtype=jnp.float32)

    init = 0.25
    weight_c = jnp.full((C,), init, dtype=jnp.float32)   # num_parameters=C
    weight_1 = jnp.full((1,), init, dtype=jnp.float32)   # num_parameters=1

    # Per-channel weight, 128-multiple spatial (layout A).
    out = my_prelu(x, weight_c)
    jax.block_until_ready(out)
    ref = jnp.maximum(x, 0) + weight_c.reshape(1, C, 1, 1) * jnp.minimum(x, 0)
    assert out.shape == x.shape and out.dtype == x.dtype
    assert jnp.allclose(out, ref, atol=1e-6), "mismatch (per-channel, layout A)"

    # Scalar weight (SMEM path).
    out1 = my_prelu(x, weight_1)
    jax.block_until_ready(out1)
    ref1 = jnp.maximum(x, 0) + init * jnp.minimum(x, 0)
    assert jnp.allclose(out1, ref1, atol=1e-6), "mismatch (scalar weight)"

    # Per-channel weight, non-128-multiple spatial (layout B: H*W = 49).
    xb = jax.random.normal(k1, (N, C, 7, 7), dtype=jnp.float32)
    outb = my_prelu(xb, weight_c)
    jax.block_until_ready(outb)
    refb = jnp.maximum(xb, 0) + weight_c.reshape(1, C, 1, 1) * jnp.minimum(xb, 0)
    assert jnp.allclose(outb, refb, atol=1e-6), "mismatch (per-channel, layout B)"

    print("KERNEL_OK")
</pallas_src>

<mosaic_0001>
module attributes {stable_mosaic.version = 11 : i64} {
  func.func @_prelu_vecw_kernel(%arg0: i32, %arg1: i32, %arg2: memref<8x256xf32, #tpu.memory_space<vmem>>, %arg3: memref<8x1xf32, #tpu.memory_space<vmem>>, %arg4: memref<8x256xf32, #tpu.memory_space<vmem>>) attributes {dimension_semantics = [#tpu.dimension_semantics<parallel>, #tpu.dimension_semantics<parallel>], iteration_bounds = array<i64: 1, 1>, scalar_prefetch = 0 : i64, scratch_operands = 0 : i64, tpu.core_type = #tpu.core_type<tc>, window_params = [{transform_indices = @transform_0, window_bounds = array<i64: 8, 256>}, {transform_indices = @transform_1, window_bounds = array<i64: 8, 1>}, {transform_indices = @transform_2, window_bounds = array<i64: 8, 256>}]} {
    %c0 = arith.constant 0 : index
    %c0_0 = arith.constant 0 : index
    %0 = vector.load %arg2[%c0, %c0_0] : memref<8x256xf32, #tpu.memory_space<vmem>>, vector<8x256xf32>
    %c0_1 = arith.constant 0 : index
    %c0_2 = arith.constant 0 : index
    %1 = vector.load %arg3[%c0_1, %c0_2] : memref<8x1xf32, #tpu.memory_space<vmem>>, vector<8x1xf32>
    %cst = arith.constant 0.000000e+00 : f32
    %2 = vector.broadcast %cst : f32 to vector<8x256xf32>
    %3 = arith.cmpf ogt, %0, %2 : vector<8x256xf32>
    %4 = vector.broadcast %1 : vector<8x1xf32> to vector<8x256xf32>
    %5 = arith.mulf %4, %0 : vector<8x256xf32>
    %6 = arith.select %3, %0, %5 : vector<8x256xi1>, vector<8x256xf32>
    %c0_3 = arith.constant 0 : index
    %c0_4 = arith.constant 0 : index
    %7 = vector.load %arg4[%c0_3, %c0_4] : memref<8x256xf32, #tpu.memory_space<vmem>>, vector<8x256xf32>
    tpu.vector_store %arg4[%c0_3, %c0_4], %6 {strides = array<i32>} : memref<8x256xf32, #tpu.memory_space<vmem>>, vector<8x256xf32>,
    return
  }
  func.func @transform_0(%arg0: i32, %arg1: i32) -> (i32, i32) {
    %c0_i32 = arith.constant 0 : i32
    return %arg0, %arg1 : i32, i32
  }
  func.func @transform_1(%arg0: i32, %arg1: i32) -> (i32, i32) {
    %c0_i32 = arith.constant 0 : i32
    %c0_i32_0 = arith.constant 0 : i32
    return %arg0, %c0_i32 : i32, i32
  }
  func.func @transform_2(%arg0: i32, %arg1: i32) -> (i32, i32) {
    %c0_i32 = arith.constant 0 : i32
    return %arg0, %arg1 : i32, i32
  }
}

</mosaic_0001>

<bundles_post_ra>
// kernel: tpu_custom_call.1
= control target key start
LH: loop header
LB: loop body
LE: loop exit
PB: predicated region body
PF: predicated region fallthrough
CT: control target
= control target key end

     0   :  { %7 = vsyncpa [#allocation3], 0  ;;  %s152_s0 = inlined_call_operand.hbm [shape: f32[8,256], index: 0, kind: input, shape index: {}]   ;;  %s153_s1 = inlined_call_operand.vmem [shape: f32[8,1], index: 1, kind: input, shape index: {}]   ;;  %s154_s2 = inlined_call_operand.hbm [shape: f32[8,256], index: 2, kind: output, shape index: {}]  }
   0x1   :  { %8 = vsyncpa [#allocation4], 0  ;;  %s107_s9 = smov [#allocation2]   ;;  %s59_s13 = scalar_lea.hbm %s152_s0, 256 }
   0x2   :  { %s15_s10 = sshll.u32 %s107_s9, 4  ;;  %p60_p0 = scmp.ne.s32.totalorder %s152_s0, %s59_s13  ;;  %s16_s10 = int_to_ptr.vmem [resolvable:$true] %s15_s10 }
   0x3   :  { %p63_p1 = scmp.lt.u32.totalorder %s59_s13, %s152_s0 }
   0x5   :  { %p65_p2 = pnand %p63_p1, %p60_p0 }
   0x7   :  { %68 = shalt.err (!%p65_p2)
}
   0x8   :  { %s69_s18 = scalar_lea.vmem %s16_s10, 256  ;;  %p74_p4 = scmp.lt.s32.totalorder %s16_s10, %s16_s10 }
   0x9   :  { %p70_p3 = scmp.ne.s32.totalorder %s16_s10, %s69_s18  ;;  %p75_p5 = scmp.lt.s32.totalorder %s69_s18, %s69_s18 }
   0xb   :  { %p76_p6 = por %p75_p5, %p74_p4 }
   0xd   :  { %p77_p7 = pnand %p76_p6, %p70_p3 }
   0xf   :  { %80 = shalt.err (!%p77_p7)
}
  0x10   :  { %18 = dma.hbm_to_vmem [thread:$0]  %s152_s0, 256, %s16_s10, [#allocation3]  }
  0x11   :  { %103 = dma.done.wait [#allocation3], 256  }
  0x12   :  { %104 = vsyncadd [#allocation3], 4294967040  ;;  %v108_v0 = vmov 0   ;;  %v26_v1 = vld [vmem:[%s153_s1] sm:$0xff]  ;;  %v25_v3 = vld [vmem:[#allocation2 + $0x8] sm:$0xff]  ;;  %s109_s23 = smov [#allocation5]  }
  0x13   :  { %58 = vset.pattern.permute.xlu0 %v108_v0  ;;  %v24_v2 = vld [vmem:[#allocation2] sm:$0xff]  ;;  %s46_s24 = sshll.u32 %s109_s23, 4  ;;  %vm28_vm1 = vcmp.gt.f32.partialorder %v25_v3, 0.0  ;;  %s47_s24 = int_to_ptr.vmem [resolvable:$true] %s46_s24 }
  0x14   :  { %31 = vperm.xlu0 %58, %v26_v1   ;;  %vm27_vm0 = vcmp.gt.f32.partialorder %v24_v2, 0.0  ;;  %s81_s0 = scalar_lea.vmem %s47_s24, 256  ;;  %p86_p9 = scmp.lt.s32.totalorder %s47_s24, %s47_s24 }
  0x15   :  { %p82_p8 = scmp.ne.s32.totalorder %s47_s24, %s81_s0  ;;  %p87_p10 = scmp.lt.s32.totalorder %s81_s0, %s81_s0 }
  0x17   :  { %p88_p11 = por %p87_p10, %p86_p9 }
  0x19   :  { %p89_p12 = pnand %p88_p11, %p82_p8 }
  0x93   :  { %v32_v4 = vpop.permute.xlu0 %31 }
  0x94   :  { %v34_v5 = vmul.f32 %v32_v4, %v24_v2  ;;  %v35_v6 = vmul.f32 %v32_v4, %v25_v3 }
  0x96   :  { %v36_v7 = vsel %vm27_vm0, %v24_v2, %v34_v5  ;;  %v37_v8 = vsel %vm28_vm1, %v25_v3, %v35_v6 }
  0x97   :  { %38 = vst [vmem:[#allocation5] sm:$0xff] %v36_v7  ;;  %39 = vst [vmem:[#allocation5 + $0x8] sm:$0xff] %v37_v8 }
  0x98   :  { %92 = shalt.err (!%p89_p12)
}
  0x99   :  { %s93_s26 = scalar_lea.hbm %s154_s2, 256 }
  0x9a   :  { %p94_p13 = scmp.ne.s32.totalorder %s154_s2, %s93_s26  ;;  %p97_p0 = scmp.lt.u32.totalorder %s93_s26, %s154_s2 }
  0x9c   :  { %p99_p1 = pnand %p97_p0, %p94_p13 }
  0x9e   :  { %102 = shalt.err (!%p99_p1)
}
  0x9f   :  { %49 = dma.vmem_to_hbm [thread:$0]  %s47_s24, 256, %s154_s2, [#allocation4]  }
  0xa0   :  { %105 = dma.done.wait [#allocation4], 256  }
  0xa1   :  { %106 = vsyncadd [#allocation4], 4294967040 }
  0xa2   :  { %53 = vsyncpa [#allocation3], 1 }
  0xa3   :  { %54 = vsyncpa [#allocation4], 1 }

</bundles_post_ra>
